<compile_context>
chip_gen: v6e
topology: v6e:2x2x1
jax: 0.10.0
libtpu: 0.0.40
codegen_flags: <defaults>
</compile_context>

<pallas_src>
import functools
import math

import jax
import jax.numpy as jnp
from jax.experimental import pallas as pl
from jax.experimental.pallas import tpu as pltpu


def _embed_gather_kernel(tok_ref, table_ref, o_ref, buf_ref, sem_ref, *, tm, scale):
    # tok_ref:   SMEM (M_pad,) int32 token ids         (scalar prefetch)
    # table_ref: HBM  (vocab, d_pad) embedding table    (memory_space=pl.ANY)
    # o_ref:     VMEM (tm, d_pad) output tile           (auto-pipelined writeback)
    # buf_ref:   VMEM (2, tm, d_pad) double-buffered gather scratch
    # sem_ref:   DMA semaphores (2,) -- one aggregate semaphore per slot
    o = pl.program_id(0)                 # "parallel" chunk (megacore shard on v7x)
    j = pl.program_id(1)                 # "arbitrary" step within the chunk
    nj = pl.num_programs(1)

    def issue_tile(tile_idx, slot):
        # Issue all tm row-gather DMAs for `tile_idx`; they all signal the same
        # per-slot semaphore so a single aggregate wait covers the whole tile.
        base = pl.multiple_of(tile_idx * tm, tm)

        @pl.loop(0, tm)
        def _(r):
            tok = tok_ref[base + r]      # SMEM read (before any DMA wait)
            pltpu.make_async_copy(
                table_ref.at[pl.ds(tok, 1), :],
                buf_ref.at[slot, pl.ds(r, 1), :],
                sem_ref.at[slot],
            ).start()

    # Prologue: the first step of each sequential chunk primes slot 0.
    @pl.when(j == 0)
    def _():
        issue_tile(o * nj, 0)

    # Prefetch the next tile's rows into the other slot BEFORE waiting on the
    # current slot, hiding the gather latency behind this step's scale+store.
    @pl.when(j + 1 < nj)
    def _():
        issue_tile(o * nj + j + 1, (j + 1) % 2)

    slot = j % 2
    # Aggregate wait: one wait sized to the whole (tm, d_pad) tile instead of
    # tm unrolled per-row waits (DMA semaphores count bytes).
    pltpu.make_async_copy(buf_ref.at[slot], buf_ref.at[slot], sem_ref.at[slot]).wait()

    vals = buf_ref[slot]
    o_ref[...] = (vals * jnp.asarray(scale, dtype=vals.dtype)).astype(o_ref.dtype)
    # TODO(synk): nn.Dropout is identity in eval mode; training-mode dropout
    # (PRNG mask via pltpu.prng_seed / prng_random_bits) is not implemented.


def _round_up(x, m):
    return (x + m - 1) // m * m


@functools.partial(jax.jit, static_argnames=("tm",))
def input_embedding(tokens, table, *, tm=256):
    """tokens: int array [batch, seq]; table: [vocab_size, d_model] embedding weights."""
    batch, seq = tokens.shape
    vocab, d_model = table.shape
    scale = math.sqrt(d_model)

    M = batch * seq

    # Row-tile size: large to amortize per-step overhead, clamped to the
    # (sublane-rounded) number of rows; always a multiple of 8.
    tm = max(8, min(_round_up(M, 8), _round_up(tm, 8)))

    # Lane-dense feature dim: pad to a multiple of 128.
    d_pad = _round_up(d_model, 128)
    if d_pad != d_model:
        table = jnp.pad(table, ((0, 0), (0, d_pad - d_model)))

    # 2-D grid: outer "parallel" (core-shardable) chunks x inner "arbitrary"
    # steps carrying the double-buffered gather pipeline.
    n_tiles = pl.cdiv(M, tm)
    n_outer = 2 if n_tiles >= 2 else 1
    n_inner = pl.cdiv(n_tiles, n_outer)
    M_pad = n_outer * n_inner * tm

    tok_flat = tokens.reshape(M).astype(jnp.int32)
    if M_pad != M:
        # Padded rows gather row 0 (always valid) and are sliced off below.
        tok_flat = jnp.pad(tok_flat, (0, M_pad - M))

    tile_bytes = tm * d_pad * table.dtype.itemsize
    # ~2x output double-buffer + 2x gather scratch + headroom; capped for v7x's
    # 64 MiB/TC, floored above v5e's 16 MiB default scoped limit.
    vmem_limit = int(min(48 * 2**20, max(32 * 2**20, 8 * tile_bytes)))

    out2d = pl.pallas_call(
        functools.partial(_embed_gather_kernel, tm=tm, scale=scale),
        out_shape=jax.ShapeDtypeStruct((M_pad, d_pad), table.dtype),
        grid_spec=pltpu.PrefetchScalarGridSpec(
            num_scalar_prefetch=1,                        # token ids land in SMEM
            grid=(n_outer, n_inner),
            in_specs=[pl.BlockSpec(memory_space=pl.ANY)],  # table stays in HBM
            out_specs=pl.BlockSpec(
                (tm, d_pad), lambda o, j, tok: (o * n_inner + j, 0)),
            scratch_shapes=[
                pltpu.VMEM((2, tm, d_pad), table.dtype),
                pltpu.SemaphoreType.DMA((2,)),
            ],
        ),
        compiler_params=pltpu.CompilerParams(
            dimension_semantics=("parallel", "arbitrary"),
            vmem_limit_bytes=vmem_limit,
        ),
    )(tok_flat, table)

    return out2d[:M, :d_model].reshape(batch, seq, d_model)


def _reference_input_embedding(tokens, table):
    d_model = table.shape[1]
    return jnp.take(table, tokens, axis=0) * math.sqrt(d_model)


if __name__ == "__main__":
    key = jax.random.PRNGKey(0)

    # --- small test (matches module defaults; exercises lane padding) ---
    vocab_size, d_model = 64, 32
    batch, seq = 2, 8
    ktok, ktab, key = jax.random.split(key, 3)
    tokens = jax.random.randint(ktok, (batch, seq), 0, vocab_size, dtype=jnp.int32)
    table = jax.random.normal(ktab, (vocab_size, d_model), dtype=jnp.float32)

    out = jax.block_until_ready(input_embedding(tokens, table))
    ref = _reference_input_embedding(tokens, table)
    assert out.shape == (batch, seq, d_model)
    assert jnp.allclose(out, ref, atol=1e-6, rtol=1e-6)

    # --- second test: multi-tile grid exercising the double-buffered gather,
    #     2-TC grid split and padded tail rows ---
    vocab2, d_model2 = 128, 96
    batch2, seq2 = 4, 47
    ktok2, ktab2, key = jax.random.split(key, 3)
    tokens2 = jax.random.randint(ktok2, (batch2, seq2), 0, vocab2, dtype=jnp.int32)
    table2 = jax.random.normal(ktab2, (vocab2, d_model2), dtype=jnp.float32)

    out2 = jax.block_until_ready(input_embedding(tokens2, table2, tm=32))
    ref2 = _reference_input_embedding(tokens2, table2)
    assert out2.shape == (batch2, seq2, d_model2)
    assert jnp.allclose(out2, ref2, atol=1e-6, rtol=1e-6)

    print("KERNEL_OK")
</pallas_src>

<mosaic_0001>
module attributes {stable_mosaic.version = 11 : i64} {
  func.func @_embed_gather_kernel(%arg0: i32, %arg1: i32, %arg2: memref<16xi32, #tpu.memory_space<smem>>, %arg3: memref<64x128xf32, #tpu.memory_space<any>>, %arg4: memref<16x128xf32, #tpu.memory_space<vmem>>, %arg5: memref<2x16x128xf32, #tpu.memory_space<vmem>>, %arg6: memref<2x!tpu.dma_semaphore, #tpu.memory_space<semaphore_mem>>) attributes {dimension_semantics = [#tpu.dimension_semantics<parallel>, #tpu.dimension_semantics<arbitrary>], iteration_bounds = array<i64: 1, 1>, scalar_prefetch = 1 : i64, scratch_operands = 2 : i64, tpu.core_type = #tpu.core_type<tc>, window_params = [{}, {transform_indices = @transform_1, window_bounds = array<i64: 16, 128>}]} {
    %c0_i32 = arith.constant 0 : i32
    %0 = arith.cmpi eq, %arg1, %c0_i32 : i32
    %1 = arith.extui %0 : i1 to i32
    %c0_i32_0 = arith.constant 0 : i32
    %2 = arith.cmpi ne, %1, %c0_i32_0 : i32
    scf.if %2 {
      %c1_i32_15 = arith.constant 1 : i32
      %29 = arith.muli %arg0, %c1_i32_15 : i32
      %c16_i32 = arith.constant 16 : i32
      %30 = arith.muli %29, %c16_i32 : i32
      %31 = tpu.assume_multiple %30, 16 : i32
      %c0_i32_16 = arith.constant 0 : i32
      %c16_i32_17 = arith.constant 16 : i32
      %32 = arith.addi %c0_i32_16, %c16_i32_17 : i32
      %c1_i32_18 = arith.constant 1 : i32
      scf.for %arg7 = %c0_i32_16 to %32 step %c1_i32_18  : i32 {
        %c1_i32_20 = arith.constant 1 : i32
        %33 = arith.muli %arg7, %c1_i32_20 : i32
        %c0_i32_21 = arith.constant 0 : i32
        %34 = arith.addi %c0_i32_21, %33 : i32
        %35 = arith.addi %31, %34 : i32
        %36 = arith.index_cast %35 : i32 to index
        %37 = memref.load %arg2[%36] : memref<16xi32, #tpu.memory_space<smem>>
        %c0_i32_22 = arith.constant 0 : i32
        %c0_i32_23 = arith.constant 0 : i32
        %c0_i32_24 = arith.constant 0 : i32
        %38 = tpu.memref_slice %arg3[%37, %c0_i32_24] : memref<64x128xf32, #tpu.memory_space<any>> -> memref<1x128xf32, #tpu.memory_space<any>>
        %c0_i32_25 = arith.constant 0 : i32
        %39 = tpu.memref_slice %arg5[%c0_i32_22, %34, %c0_i32_25] : memref<2x16x128xf32, #tpu.memory_space<vmem>> -> memref<1x1x128xf32, #tpu.memory_space<vmem>>
        %40 = tpu.memref_squeeze %39 : memref<1x1x128xf32, #tpu.memory_space<vmem>> -> memref<1x128xf32, #tpu.memory_space<vmem>>
        %41 = tpu.memref_slice %arg6[%c0_i32_23] : memref<2x!tpu.dma_semaphore, #tpu.memory_space<semaphore_mem>> -> memref<1x!tpu.dma_semaphore, #tpu.memory_space<semaphore_mem>>
        %42 = tpu.memref_squeeze %41 : memref<1x!tpu.dma_semaphore, #tpu.memory_space<semaphore_mem>> -> memref<!tpu.dma_semaphore, #tpu.memory_space<semaphore_mem>>
        tpu.enqueue_dma source(%38 : memref<1x128xf32, #tpu.memory_space<any>>) target(%40 : memref<1x128xf32, #tpu.memory_space<vmem>>) target_semaphore(%42 : memref<!tpu.dma_semaphore, #tpu.memory_space<semaphore_mem>>)
      }
      %c16_i32_19 = arith.constant 16 : i32
    } else {
    }
    %c1_i32 = arith.constant 1 : i32
    %3 = arith.addi %arg1, %c1_i32 : i32
    %c1_i32_1 = arith.constant 1 : i32
    %4 = arith.cmpi slt, %3, %c1_i32_1 : i32
    %5 = arith.extui %4 : i1 to i32
    %c0_i32_2 = arith.constant 0 : i32
    %6 = arith.cmpi ne, %5, %c0_i32_2 : i32
    scf.if %6 {
      %c1_i32_15 = arith.constant 1 : i32
      %29 = arith.muli %arg0, %c1_i32_15 : i32
      %30 = arith.addi %29, %arg1 : i32
      %c1_i32_16 = arith.constant 1 : i32
      %31 = arith.addi %30, %c1_i32_16 : i32
      %c1_i32_17 = arith.constant 1 : i32
      %32 = arith.addi %arg1, %c1_i32_17 : i32
      %c2_i32_18 = arith.constant 2 : i32
      %c0_i32_19 = arith.constant 0 : i32
      %33 = arith.cmpi eq, %c2_i32_18, %c0_i32_19 : i32
      %c1_i32_20 = arith.constant 1 : i32
      %34 = arith.select %33, %c1_i32_20, %c2_i32_18 : i32
      %35 = arith.remsi %32, %34 : i32
      %c0_i32_21 = arith.constant 0 : i32
      %36 = arith.cmpi ne, %35, %c0_i32_21 : i32
      %c0_i32_22 = arith.constant 0 : i32
      %37 = arith.cmpi slt, %35, %c0_i32_22 : i32
      %c0_i32_23 = arith.constant 0 : i32
      %38 = arith.cmpi slt, %34, %c0_i32_23 : i32
      %39 = arith.xori %37, %38 : i1
      %40 = arith.andi %39, %36 : i1
      %41 = arith.addi %35, %34 : i32
      %42 = arith.select %40, %41, %35 : i32
      %c16_i32 = arith.constant 16 : i32
      %43 = arith.muli %31, %c16_i32 : i32
      %44 = tpu.assume_multiple %43, 16 : i32
      %c0_i32_24 = arith.constant 0 : i32
      %c16_i32_25 = arith.constant 16 : i32
      %45 = arith.addi %c0_i32_24, %c16_i32_25 : i32
      %c1_i32_26 = arith.constant 1 : i32
      scf.for %arg7 = %c0_i32_24 to %45 step %c1_i32_26  : i32 {
        %c1_i32_28 = arith.constant 1 : i32
        %46 = arith.muli %arg7, %c1_i32_28 : i32
        %c0_i32_29 = arith.constant 0 : i32
        %47 = arith.addi %c0_i32_29, %46 : i32
        %48 = arith.addi %44, %47 : i32
        %49 = arith.index_cast %48 : i32 to index
        %50 = memref.load %arg2[%49] : memref<16xi32, #tpu.memory_space<smem>>
        %c0_i32_30 = arith.constant 0 : i32
        %51 = tpu.memref_slice %arg3[%50, %c0_i32_30] : memref<64x128xf32, #tpu.memory_space<any>> -> memref<1x128xf32, #tpu.memory_space<any>>
        %c0_i32_31 = arith.constant 0 : i32
        %52 = tpu.memref_slice %arg5[%42, %47, %c0_i32_31] : memref<2x16x128xf32, #tpu.memory_space<vmem>> -> memref<1x1x128xf32, #tpu.memory_space<vmem>>
        %53 = tpu.memref_squeeze %52 : memref<1x1x128xf32, #tpu.memory_space<vmem>> -> memref<1x128xf32, #tpu.memory_space<vmem>>
        %54 = tpu.memref_slice %arg6[%42] : memref<2x!tpu.dma_semaphore, #tpu.memory_space<semaphore_mem>> -> memref<1x!tpu.dma_semaphore, #tpu.memory_space<semaphore_mem>>
        %55 = tpu.memref_squeeze %54 : memref<1x!tpu.dma_semaphore, #tpu.memory_space<semaphore_mem>> -> memref<!tpu.dma_semaphore, #tpu.memory_space<semaphore_mem>>
        tpu.enqueue_dma source(%51 : memref<1x128xf32, #tpu.memory_space<any>>) target(%53 : memref<1x128xf32, #tpu.memory_space<vmem>>) target_semaphore(%55 : memref<!tpu.dma_semaphore, #tpu.memory_space<semaphore_mem>>)
      }
      %c16_i32_27 = arith.constant 16 : i32
    } else {
    }
    %c2_i32 = arith.constant 2 : i32
    %c0_i32_3 = arith.constant 0 : i32
    %7 = arith.cmpi eq, %c2_i32, %c0_i32_3 : i32
    %c1_i32_4 = arith.constant 1 : i32
    %8 = arith.select %7, %c1_i32_4, %c2_i32 : i32
    %9 = arith.remsi %arg1, %8 : i32
    %c0_i32_5 = arith.constant 0 : i32
    %10 = arith.cmpi ne, %9, %c0_i32_5 : i32
    %c0_i32_6 = arith.constant 0 : i32
    %11 = arith.cmpi slt, %9, %c0_i32_6 : i32
    %c0_i32_7 = arith.constant 0 : i32
    %12 = arith.cmpi slt, %8, %c0_i32_7 : i32
    %13 = arith.xori %11, %12 : i1
    %14 = arith.andi %13, %10 : i1
    %15 = arith.addi %9, %8 : i32
    %16 = arith.select %14, %15, %9 : i32
    %c0_i32_8 = arith.constant 0 : i32
    %c0_i32_9 = arith.constant 0 : i32
    %17 = tpu.memref_slice %arg5[%16, %c0_i32_8, %c0_i32_9] : memref<2x16x128xf32, #tpu.memory_space<vmem>> -> memref<1x16x128xf32, #tpu.memory_space<vmem>>
    %18 = tpu.memref_squeeze %17 : memref<1x16x128xf32, #tpu.memory_space<vmem>> -> memref<16x128xf32, #tpu.memory_space<vmem>>
    %c0_i32_10 = arith.constant 0 : i32
    %c0_i32_11 = arith.constant 0 : i32
    %19 = tpu.memref_slice %arg5[%16, %c0_i32_10, %c0_i32_11] : memref<2x16x128xf32, #tpu.memory_space<vmem>> -> memref<1x16x128xf32, #tpu.memory_space<vmem>>
    %20 = tpu.memref_squeeze %19 : memref<1x16x128xf32, #tpu.memory_space<vmem>> -> memref<16x128xf32, #tpu.memory_space<vmem>>
    %21 = tpu.memref_slice %arg6[%16] : memref<2x!tpu.dma_semaphore, #tpu.memory_space<semaphore_mem>> -> memref<1x!tpu.dma_semaphore, #tpu.memory_space<semaphore_mem>>
    %22 = tpu.memref_squeeze %21 : memref<1x!tpu.dma_semaphore, #tpu.memory_space<semaphore_mem>> -> memref<!tpu.dma_semaphore, #tpu.memory_space<semaphore_mem>>
    tpu.wait_dma2 semaphore(%22 : memref<!tpu.dma_semaphore, #tpu.memory_space<semaphore_mem>>) src(%18 : memref<16x128xf32, #tpu.memory_space<vmem>>) dst(%20 : memref<16x128xf32, #tpu.memory_space<vmem>>)
    %23 = arith.index_cast %16 : i32 to index
    %c0 = arith.constant 0 : index
    %c0_12 = arith.constant 0 : index
    %24 = vector.load %arg5[%23, %c0, %c0_12] : memref<2x16x128xf32, #tpu.memory_space<vmem>>, vector<1x16x128xf32>
    %25 = vector.shape_cast %24 : vector<1x16x128xf32> to vector<16x128xf32>
    %cst = arith.constant 5.65685415 : f32
    %26 = vector.broadcast %cst : f32 to vector<16x128xf32>
    %27 = arith.mulf %25, %26 : vector<16x128xf32>
    %c0_13 = arith.constant 0 : index
    %c0_14 = arith.constant 0 : index
    %28 = vector.load %arg4[%c0_13, %c0_14] : memref<16x128xf32, #tpu.memory_space<vmem>>, vector<16x128xf32>
    tpu.vector_store %arg4[%c0_13, %c0_14], %27 {strides = array<i32>} : memref<16x128xf32, #tpu.memory_space<vmem>>, vector<16x128xf32>,
    return
  }
  func.func @transform_1(%arg0: i32, %arg1: i32, %arg2: memref<16xi32, #tpu.memory_space<smem>>) -> (i32, i32) {
    %c1_i32 = arith.constant 1 : i32
    %0 = arith.muli %arg0, %c1_i32 : i32
    %1 = arith.addi %0, %arg1 : i32
    %c0_i32 = arith.constant 0 : i32
    %c0_i32_0 = arith.constant 0 : i32
    return %1, %c0_i32 : i32, i32
  }
}

</mosaic_0001>

<bundles_post_ra>
// kernel: input_embedding.1
= control target key start
LH: loop header
LB: loop body
LE: loop exit
PB: predicated region body
PF: predicated region fallthrough
CT: control target
= control target key end

     0   :  { %s334_s0 = inlined_call_operand.vmem [shape: s32[16], index: 0, kind: input, shape index: {}]   ;;  %s335_s1 = inlined_call_operand.vmem [shape: f32[64,128], index: 1, kind: input, shape index: {}]   ;;  %s336_s2 = inlined_call_operand.vmem [shape: f32[16,128], index: 2, kind: output, shape index: {}]  }
   0x1   :  { %s7_s11 = sshll.u32 %s334_s0, 4  ;;  %s8_s11 = int_to_ptr.vmem [resolvable:$true] %s7_s11 }
   0x2   :  { %s282_s12 = scalar_lea.vmem %s8_s11, 16  ;;  %p287_p1 = scmp.lt.s32.totalorder %s8_s11, %s8_s11 }
   0x3   :  { %p283_p0 = scmp.ne.s32.totalorder %s8_s11, %s282_s12  ;;  %p288_p2 = scmp.lt.s32.totalorder %s282_s12, %s282_s12 }
   0x5   :  { %p289_p3 = por %p288_p2, %p287_p1 }
   0x7   :  { %p290_p4 = pnand %p289_p3, %p283_p0 }
   0x9   :  { %293 = shalt.err (!%p290_p4)  }
   0xa   :  { %s306_s13 = smov [#allocation5]  }
   0xb   :  { %10 = dma.vmem_to_smem %s8_s11, 16, %s306_s13, [#allocation4] }
   0xc   :  { %298 = dma.done.wait [#allocation4], 16 }
   0xd   :  { %299 = vsyncadd [#allocation4], 4294967280 }
   0xe   :  { %12 = sfence }
   0xf   :  { %s302_s14 = smov 0  }
  0x10 LB: > { %s39_s15 = sld [smem:[#allocation5 + %s304_s14]]  ;;  %s41_s18 = scalar_lea.vmem [#allocation2], %s304_s14  ;;  %s304_s14 = sphi %s302_s14, %s37_s14  }
  0x16   : > { %s40_s17 = scalar_lea.vmem %s335_s1, %s39_s15 }
  0x17   : > { %v60_v0 = vld [vmem:[%s40_s17] sm:$0x1] }
  0x18   : > { %61 = vst [vmem:[%s41_s18] sm:$0x1] %v60_v0 }
  0x19   : > { %87 = vsyncadd [#allocation3], 16  ;;  %s37_s14 = sadd.s32 1, %s304_s14  }
  0x1a   : > { %p34_p5 = scmp.ge.s32.totalorder %s37_s14, 16  }
  0x1c   :  { %36 = sbr.rel (!%p34_p5) target bundleno = 16 (0x10), region = 134 }
  0x21   :  { %300 = dma.done.wait [#allocation3], 256 }
  0x22   :  { %301 = vsyncadd [#allocation3], 4294967040  ;;  %v181_v1 = vld [vmem:[#allocation2] sm:$0xff]  ;;  %v182_v2 = vld [vmem:[#allocation2 + $0x8] sm:$0xff] }
  0x23   :  { %v183_v3 = vmul.f32 5.656854, %v181_v1  ;;  %v184_v4 = vmul.f32 5.656854, %v182_v2 }
  0x25   :  { %185 = vst [vmem:[%s336_s2] sm:$0xff] %v183_v3  ;;  %186 = vst [vmem:[%s336_s2 + $0x8] sm:$0xff] %v184_v4 }
  0x26   :  { %205 = vsyncmov [#allocation3] }
  0x29   :  { %s206_s23 = vpop.sfrf %205 }
  0x2a   :  { %p267_p6 = scmp.ne.s32.totalorder %s206_s23, 0 }
  0x2c   :  { %210 = shalt.err (%p267_p6)  }
  0x2d   :  { %212 = vsyncmov [#allocation3 + $0x1] }
  0x30   :  { %s213_s24 = vpop.sfrf %212 }
  0x31   :  { %p268_p7 = scmp.ne.s32.totalorder %s213_s24, 0 }
  0x33   :  { %217 = shalt.err (%p268_p7)  }

</bundles_post_ra>
